<compile_context>
chip_gen: v7x
topology: tpu7x:2x2x1
jax: 0.10.0
libtpu: 0.0.40
codegen_flags: <defaults>
</compile_context>

<pallas_src>
import jax
import jax.numpy as jnp
from jax.experimental import pallas as pl
from jax.experimental.pallas import tpu as pltpu


def _round_up(x, m):
    return ((x + m - 1) // m) * m


def critic_kernel(x_ref, w1_ref, b1_ref, w2_ref, b2_ref, w3_ref, b3_ref, o_ref):
    # Hidden layer 1: tanh(x @ W1 + b1)                     -> (TB, H1p)
    h = jnp.tanh(
        jnp.dot(x_ref[...], w1_ref[...], preferred_element_type=jnp.float32)
        + b1_ref[...]
    )
    # Hidden layer 2: tanh(h @ W2 + b2)                     -> (TB, H2p)
    h = jnp.tanh(
        jnp.dot(h, w2_ref[...], preferred_element_type=jnp.float32)
        + b2_ref[...]
    )
    # Output layer (out_features == 1): instead of an N=1 MXU matmul, transpose
    # the hidden tile (XLU) and do a VPU multiply + sublane reduce, giving a
    # lane-dense (1, TB) result (batch lives in the lane axis of the output).
    ht = h.T                                               # (H2p, TB)
    o_ref[...] = (
        jnp.sum(ht * w3_ref[...], axis=0, keepdims=True)    # (1, TB)
        + b3_ref[...]                                       # (1, 1) broadcast
    )


def critic_forward(obs, params, *, block_b=None):
    """obs: (B, obs_size) float32. Returns value estimates of shape (B,)."""
    w1, b1, w2, b2, w3, b3 = params
    B, obs_size = obs.shape
    H1 = w1.shape[1]
    H2 = w2.shape[1]
    H1p = _round_up(H1, 128)
    H2p = _round_up(H2, 128)

    # Batch tile: multiple of 128 (needed for the lane-dense output block and
    # the in-kernel 128-aligned transpose). Cap so the tile stays far below the
    # v7x 64 MiB VMEM even with double-buffering and large obs_size.
    if block_b is None:
        block_b = min(1024, _round_up(B, 128))
    block_b = _round_up(block_b, 128)
    B_pad = _round_up(B, block_b)
    n_tiles = B_pad // block_b

    # Zero-padding keeps the math exact: padded obs rows are sliced away at the
    # end; padded hidden units see zero weights + zero bias, tanh(0)=0, and
    # feed zero rows into the next layer.
    obs_p = jnp.pad(obs, ((0, B_pad - B), (0, 0)))
    w1p = jnp.pad(w1, ((0, 0), (0, H1p - H1)))
    b1p = jnp.pad(b1, ((0, 0), (0, H1p - H1)))
    w2p = jnp.pad(w2, ((0, H1p - H1), (0, H2p - H2)))
    b2p = jnp.pad(b2, ((0, 0), (0, H2p - H2)))
    w3p = jnp.pad(w3, ((0, H2p - H2), (0, 0)))
    # b3 stays (1, 1)

    def resident(*shape):
        # Constant index_map -> block stays VMEM-resident across grid steps
        # (weights are DMA'd once per call, not once per batch tile).
        return pl.BlockSpec(shape, lambda i: (0,) * len(shape))

    flops = 2 * B_pad * (obs_size * H1p + H1p * H2p + H2p)
    transcendentals = B_pad * (H1p + H2p)
    bytes_accessed = 4 * (
        obs_p.size + w1p.size + b1p.size + w2p.size + b2p.size
        + w3p.size + b3.size + B_pad
    )

    out = pl.pallas_call(
        critic_kernel,
        out_shape=jax.ShapeDtypeStruct((1, B_pad), jnp.float32),
        grid_spec=pltpu.PrefetchScalarGridSpec(
            num_scalar_prefetch=0,
            grid=(n_tiles,),
            in_specs=[
                pl.BlockSpec((block_b, obs_size), lambda i: (i, 0)),  # obs tile
                resident(obs_size, H1p),   # W1
                resident(1, H1p),          # b1
                resident(H1p, H2p),        # W2
                resident(1, H2p),          # b2
                resident(H2p, 1),          # W3 (used as a lane-broadcast column)
                resident(1, 1),            # b3
            ],
            out_specs=pl.BlockSpec((1, block_b), lambda i: (0, i)),
        ),
        compiler_params=pltpu.CompilerParams(
            dimension_semantics=("parallel",),      # megacore sharding on v7x
            vmem_limit_bytes=32 * 1024 * 1024,      # safe on v7x's 64 MiB VMEM
        ),
        cost_estimate=pl.CostEstimate(
            flops=flops,
            transcendentals=transcendentals,
            bytes_accessed=bytes_accessed,
        ),
    )(obs_p, w1p, b1p, w2p, b2p, w3p, b3)

    # Output is lane-major (1, B_pad); un-transpose + strip padding + squeeze.
    return out[0, :B]


def init_params(key, obs_size, hid_size):
    """Deterministic init matching the MLP layer shapes in Critic.__init__."""
    sizes = [obs_size] + list(hid_size) + [1]
    params = []
    for j in range(len(sizes) - 1):
        key, kw, kb = jax.random.split(key, 3)
        fan_in = sizes[j]
        bound = 1.0 / jnp.sqrt(fan_in)
        # Stored as (in, out) so the kernel does x @ W (torch stores (out, in)).
        w = jax.random.uniform(
            kw, (sizes[j], sizes[j + 1]), jnp.float32, -bound, bound
        )
        b = jax.random.uniform(
            kb, (1, sizes[j + 1]), jnp.float32, -bound, bound
        )
        params += [w, b]
    return tuple(params)


if __name__ == "__main__":
    key = jax.random.PRNGKey(0)

    batch = 8
    obs_size = 32
    hid_size = (64, 64)  # two hidden layers, tanh activation (typical PPO setup)

    k_obs, k_params = jax.random.split(key)
    obs = jax.random.normal(k_obs, (batch, obs_size), dtype=jnp.float32)
    params = init_params(k_params, obs_size, hid_size)

    values = critic_forward(obs, params)
    jax.block_until_ready(values)

    # Pure-JAX reference check of the fused kernel (unpadded weights).
    w1, b1, w2, b2, w3, b3 = params
    ref = jnp.tanh(obs @ w1 + b1)
    ref = jnp.tanh(ref @ w2 + b2)
    ref = jnp.squeeze(ref @ w3 + b3, axis=-1)
    assert values.shape == (batch,)
    assert jnp.allclose(values, ref, atol=1e-4, rtol=1e-5)

    print("KERNEL_OK")
</pallas_src>

<mosaic_0001>
module attributes {stable_mosaic.version = 11 : i64} {
  func.func @critic_kernel(%arg0: i32, %arg1: memref<128x32xf32, #tpu.memory_space<vmem>>, %arg2: memref<32x128xf32, #tpu.memory_space<vmem>>, %arg3: memref<1x128xf32, #tpu.memory_space<vmem>>, %arg4: memref<128x128xf32, #tpu.memory_space<vmem>>, %arg5: memref<1x128xf32, #tpu.memory_space<vmem>>, %arg6: memref<128x1xf32, #tpu.memory_space<vmem>>, %arg7: memref<1x1xf32, #tpu.memory_space<vmem>>, %arg8: memref<1x128xf32, #tpu.memory_space<vmem>>) attributes {dimension_semantics = [#tpu.dimension_semantics<parallel>], iteration_bounds = array<i64: 1>, scalar_prefetch = 0 : i64, scratch_operands = 0 : i64, tpu.core_type = #tpu.core_type<tc>, window_params = [{transform_indices = @transform_0, window_bounds = array<i64: 128, 32>}, {pipeline_mode = #tpu.pipeline_mode<synchronous>, transform_indices = @transform_1, window_bounds = array<i64: 32, 128>}, {pipeline_mode = #tpu.pipeline_mode<synchronous>, transform_indices = @transform_2, window_bounds = array<i64: 1, 128>}, {pipeline_mode = #tpu.pipeline_mode<synchronous>, transform_indices = @transform_3, window_bounds = array<i64: 128, 128>}, {pipeline_mode = #tpu.pipeline_mode<synchronous>, transform_indices = @transform_4, window_bounds = array<i64: 1, 128>}, {pipeline_mode = #tpu.pipeline_mode<synchronous>, transform_indices = @transform_5, window_bounds = array<i64: 128, 1>}, {pipeline_mode = #tpu.pipeline_mode<synchronous>, transform_indices = @transform_6, window_bounds = array<i64: 1, 1>}, {transform_indices = @transform_7, window_bounds = array<i64: 1, 128>}]} {
    %c0 = arith.constant 0 : index
    %c0_0 = arith.constant 0 : index
    %0 = vector.load %arg1[%c0, %c0_0] : memref<128x32xf32, #tpu.memory_space<vmem>>, vector<128x32xf32>
    %c0_1 = arith.constant 0 : index
    %c0_2 = arith.constant 0 : index
    %1 = vector.load %arg2[%c0_1, %c0_2] : memref<32x128xf32, #tpu.memory_space<vmem>>, vector<32x128xf32>
    %cst = arith.constant dense<0.000000e+00> : vector<128x128xf32>
    %2 = tpu.matmul %0, %1, %cst {dimension_numbers = #tpu.dot_dimension_numbers<[1], [0], [0], [1], [0, 0, 1, 1], [], []>} : vector<128x32xf32>, vector<32x128xf32>, vector<128x128xf32> -> vector<128x128xf32>
    %c0_3 = arith.constant 0 : index
    %c0_4 = arith.constant 0 : index
    %3 = vector.load %arg3[%c0_3, %c0_4] : memref<1x128xf32, #tpu.memory_space<vmem>>, vector<1x128xf32>
    %4 = vector.broadcast %3 : vector<1x128xf32> to vector<128x128xf32>
    %5 = arith.addf %2, %4 : vector<128x128xf32>
    %6 = math.tanh %5 : vector<128x128xf32>
    %c0_5 = arith.constant 0 : index
    %c0_6 = arith.constant 0 : index
    %7 = vector.load %arg4[%c0_5, %c0_6] : memref<128x128xf32, #tpu.memory_space<vmem>>, vector<128x128xf32>
    %cst_7 = arith.constant dense<0.000000e+00> : vector<128x128xf32>
    %8 = tpu.matmul %6, %7, %cst_7 {dimension_numbers = #tpu.dot_dimension_numbers<[1], [0], [0], [1], [0, 0, 1, 1], [], []>} : vector<128x128xf32>, vector<128x128xf32>, vector<128x128xf32> -> vector<128x128xf32>
    %c0_8 = arith.constant 0 : index
    %c0_9 = arith.constant 0 : index
    %9 = vector.load %arg5[%c0_8, %c0_9] : memref<1x128xf32, #tpu.memory_space<vmem>>, vector<1x128xf32>
    %10 = vector.broadcast %9 : vector<1x128xf32> to vector<128x128xf32>
    %11 = arith.addf %8, %10 : vector<128x128xf32>
    %12 = math.tanh %11 : vector<128x128xf32>
    %13 = tpu.transpose %12, [1, 0] : vector<128x128xf32> -> vector<128x128xf32>
    %c0_10 = arith.constant 0 : index
    %c0_11 = arith.constant 0 : index
    %14 = vector.load %arg6[%c0_10, %c0_11] : memref<128x1xf32, #tpu.memory_space<vmem>>, vector<128x1xf32>
    %15 = vector.broadcast %14 : vector<128x1xf32> to vector<128x128xf32>
    %16 = arith.mulf %13, %15 : vector<128x128xf32>
    %cst_12 = arith.constant dense<0.000000e+00> : vector<128xf32>
    %17 = vector.multi_reduction <add>, %16, %cst_12 [0] : vector<128x128xf32> to vector<128xf32>
    %18 = vector.shape_cast %17 : vector<128xf32> to vector<1x128xf32>
    %c0_13 = arith.constant 0 : index
    %c0_14 = arith.constant 0 : index
    %19 = vector.load %arg7[%c0_13, %c0_14] : memref<1x1xf32, #tpu.memory_space<vmem>>, vector<1x1xf32>
    %20 = vector.broadcast %19 : vector<1x1xf32> to vector<1x128xf32>
    %21 = arith.addf %18, %20 : vector<1x128xf32>
    %c0_15 = arith.constant 0 : index
    %c0_16 = arith.constant 0 : index
    %22 = vector.load %arg8[%c0_15, %c0_16] : memref<1x128xf32, #tpu.memory_space<vmem>>, vector<1x128xf32>
    tpu.vector_store %arg8[%c0_15, %c0_16], %21 {strides = array<i32>} : memref<1x128xf32, #tpu.memory_space<vmem>>, vector<1x128xf32>,
    return
  }
  func.func @transform_0(%arg0: i32) -> (i32, i32) {
    %c0_i32 = arith.constant 0 : i32
    %c0_i32_0 = arith.constant 0 : i32
    return %arg0, %c0_i32 : i32, i32
  }
  func.func @transform_1(%arg0: i32) -> (i32, i32) {
    %c0_i32 = arith.constant 0 : i32
    %c0_i32_0 = arith.constant 0 : i32
    %c0_i32_1 = arith.constant 0 : i32
    return %c0_i32, %c0_i32_0 : i32, i32
  }
  func.func @transform_2(%arg0: i32) -> (i32, i32) {
    %c0_i32 = arith.constant 0 : i32
    %c0_i32_0 = arith.constant 0 : i32
    %c0_i32_1 = arith.constant 0 : i32
    return %c0_i32, %c0_i32_0 : i32, i32
  }
  func.func @transform_3(%arg0: i32) -> (i32, i32) {
    %c0_i32 = arith.constant 0 : i32
    %c0_i32_0 = arith.constant 0 : i32
    %c0_i32_1 = arith.constant 0 : i32
    return %c0_i32, %c0_i32_0 : i32, i32
  }
  func.func @transform_4(%arg0: i32) -> (i32, i32) {
    %c0_i32 = arith.constant 0 : i32
    %c0_i32_0 = arith.constant 0 : i32
    %c0_i32_1 = arith.constant 0 : i32
    return %c0_i32, %c0_i32_0 : i32, i32
  }
  func.func @transform_5(%arg0: i32) -> (i32, i32) {
    %c0_i32 = arith.constant 0 : i32
    %c0_i32_0 = arith.constant 0 : i32
    %c0_i32_1 = arith.constant 0 : i32
    return %c0_i32, %c0_i32_0 : i32, i32
  }
  func.func @transform_6(%arg0: i32) -> (i32, i32) {
    %c0_i32 = arith.constant 0 : i32
    %c0_i32_0 = arith.constant 0 : i32
    %c0_i32_1 = arith.constant 0 : i32
    return %c0_i32, %c0_i32_0 : i32, i32
  }
  func.func @transform_7(%arg0: i32) -> (i32, i32) {
    %c0_i32 = arith.constant 0 : i32
    %c0_i32_0 = arith.constant 0 : i32
    return %c0_i32, %arg0 : i32, i32
  }
}

</mosaic_0001>

<bundles_post_ra>
// kernel: tpu_custom_call.1
= control target key start
LH: loop header
LB: loop body
LE: loop exit
PB: predicated region body
PF: predicated region fallthrough
CT: control target
= control target key end

     0   :  { %s1220_s0 = inlined_call_operand.vmem [shape: f32[128,32], index: 0, kind: input, shape index: {}]   ;;  %s1221_s1 = inlined_call_operand.vmem [shape: f32[32,128], index: 1, kind: input, shape index: {}]   ;;  %s1222_s2 = inlined_call_operand.vmem [shape: f32[1,128], index: 2, kind: input, shape index: {}]   ;;  %s1223_s3 = inlined_call_operand.vmem [shape: f32[128,128], index: 3, kind: input, shape index: {}]   ;;  %s1224_s4 = inlined_call_operand.vmem [shape: f32[1,128], index: 4, kind: input, shape index: {}]   ;;  %s1225_s5 = inlined_call_operand.vmem [shape: f32[128,1], index: 5, kind: input, shape index: {}]   ;;  %s1226_s6 = inlined_call_operand.<no memory space> [shape: f32[1,1], index: 6, kind: input, shape index: {}]   ;;  %s1227_s7 = inlined_call_operand.hbm [shape: f32[1,128], index: 7, kind: output, shape index: {}]  }
   0x1   :  { %v12_v0 = vstv %s1226_s6 }
   0x2   :  { %13 = vst [vmem:[#allocation2] sm:$0x1] %v12_v0 }
   0x3   :  { %v45_v1 = vld [vmem:[%s1221_s1] sm:$0xff]  ;;  %v46_v2 = vld [vmem:[%s1221_s1 + $0x8] sm:$0xff]  ;;  %v47_v3 = vld [vmem:[%s1221_s1 + $0x10] sm:$0xff]  ;;  %vm56_vm0 = vcmask 261120  }
   0x4   :  { %v799_v4 = vpack.c.bf16 %v46_v2, %v45_v1  ;;  %v48_v5 = vld [vmem:[%s1221_s1 + $0x18] sm:$0xff]  ;;  %v29_v6 = vld [vmem:[%s1220_s0] sm:$0xff]  ;;  %v267_v9 = vld [vmem:[%s1223_s3 + $0x8] sm:$0xff] }
   0x5   :  { %v803_v7 = vpack.c.bf16 %v48_v5, %v47_v3  ;;  %719 = vmatprep.mubr.msk.f32.mxu0 %vm56_vm0, %v29_v6  ;;  %v266_v8 = vld [vmem:[%s1223_s3] sm:$0xff]  ;;  %v268_v10 = vld [vmem:[%s1223_s3 + $0x10] sm:$0xff]  ;;  %v269_v11 = vld [vmem:[%s1223_s3 + $0x18] sm:$0xff] }
   0x6   :  { %800 = vmatprep.subr.bf16.mxu0 %v799_v4  ;;  %v30_v12 = vld [vmem:[%s1220_s0 + $0x8] sm:$0xff]  ;;  %v807_v13 = vpack.c.bf16 %v267_v9, %v266_v8  ;;  %v31_v14 = vld [vmem:[%s1220_s0 + $0x10] sm:$0xff]  ;;  %v811_v15 = vpack.c.bf16 %v269_v11, %v268_v10  ;;  %v270_v16 = vld [vmem:[%s1223_s3 + $0x20] sm:$0xff] }
   0x7   :  { %802 = vmatpush3.bf16.msra.mxu0 %v799_v4  ;;  %v271_v17 = vld [vmem:[%s1223_s3 + $0x28] sm:$0xff] }
   0x8   :  { %804 = vmatprep.subr.bf16.mxu0 %v803_v7  ;;  %839 = vmatprep.subr.bf16.mxu1 %v807_v13 }
   0xb   :  { %806 = vmatpush3.bf16.msra.mxu0 %v803_v7 }
   0xc   :  { %808 = vmatprep.subr.bf16.mxu0 %v807_v13 }
   0xd   :  { %14 = vsyncpa [#allocation4], 0  ;;  %847 = vmatpush3.bf16.msra.mxu1 %v807_v13  ;;  %v32_v18 = vld [vmem:[%s1220_s0 + $0x18] sm:$0xff]  ;;  %v33_v19 = vld [vmem:[%s1220_s0 + $0x20] sm:$0xff]  ;;  %v815_v20 = vpack.c.bf16 %v271_v17, %v270_v16  ;;  %v947_v48 = vmov 0  }
   0xe   :  { %720 = vmatmul.mubr.msk.f32.vlgmr.msra.gmra.mrb[0].mxu0 %vm56_vm0, %v30_v12  ;;  %840 = vmatprep.subr.bf16.mxu1 %v811_v15  ;;  %v272_v21 = vld [vmem:[%s1223_s3 + $0x30] sm:$0xff]  ;;  %v273_v22 = vld [vmem:[%s1223_s3 + $0x38] sm:$0xff]  ;;  %v34_v23 = vld [vmem:[%s1220_s0 + $0x28] sm:$0xff] }
   0xf   :  { %722 = vmatprep.mubr.msk.f32.mxu0 %vm56_vm0, %v31_v14  ;;  %810 = vmatpush3.bf16.msra.mxu0 %v807_v13  ;;  %v35_v24 = vld [vmem:[%s1220_s0 + $0x30] sm:$0xff]  ;;  %v819_v25 = vpack.c.bf16 %v273_v22, %v272_v21  ;;  %v274_v26 = vld [vmem:[%s1223_s3 + $0x40] sm:$0xff]  ;;  %v275_v27 = vld [vmem:[%s1223_s3 + $0x48] sm:$0xff] }
  0x10   :  { %812 = vmatprep.subr.bf16.mxu0 %v811_v15  ;;  %v36_v28 = vld [vmem:[%s1220_s0 + $0x38] sm:$0xff]  ;;  %v37_v29 = vld [vmem:[%s1220_s0 + $0x40] sm:$0xff]  ;;  %v823_v30 = vpack.c.bf16 %v275_v27, %v274_v26  ;;  %v38_v31 = vld [vmem:[%s1220_s0 + $0x48] sm:$0xff]  ;;  %857 = vset.pattern.permute.xlu1 %v947_v48 }
  0x11   :  { %848 = vmatpush3.bf16.msra.mxu1 %v811_v15  ;;  %v39_v32 = vld [vmem:[%s1220_s0 + $0x50] sm:$0xff]  ;;  %v40_v33 = vld [vmem:[%s1220_s0 + $0x58] sm:$0xff]  ;;  %v41_v34 = vld [vmem:[%s1220_s0 + $0x60] sm:$0xff] }
  0x12   :  { %723 = vmatmul.mubr.msk.f32.gmra.mrb[2].mxu0 %vm56_vm0, %v32_v18  ;;  %841 = vmatprep.subr.bf16.mxu1 %v815_v20  ;;  %v42_v35 = vld [vmem:[%s1220_s0 + $0x68] sm:$0xff]  ;;  %v43_v36 = vld [vmem:[%s1220_s0 + $0x70] sm:$0xff]  ;;  %v44_v37 = vld [vmem:[%s1220_s0 + $0x78] sm:$0xff] }
  0x13   :  { %725 = vmatprep.mubr.msk.f32.mxu0 %vm56_vm0, %v33_v19  ;;  %814 = vmatpush3.bf16.msra.mxu0 %v811_v15  ;;  %v276_v38 = vld [vmem:[%s1223_s3 + $0x50] sm:$0xff]  ;;  %v277_v39 = vld [vmem:[%s1223_s3 + $0x58] sm:$0xff]  ;;  %v278_v41 = vld [vmem:[%s1223_s3 + $0x60] sm:$0xff] }
  0x14   :  { %816 = vmatprep.subr.bf16.mxu0 %v815_v20  ;;  %v827_v40 = vpack.c.bf16 %v277_v39, %v276_v38  ;;  %v279_v42 = vld [vmem:[%s1223_s3 + $0x68] sm:$0xff]  ;;  %v280_v44 = vld [vmem:[%s1223_s3 + $0x70] sm:$0xff]  ;;  %v281_v45 = vld [vmem:[%s1223_s3 + $0x78] sm:$0xff] }
  0x15   :  { %849 = vmatpush3.bf16.msra.mxu1 %v815_v20  ;;  %v831_v43 = vpack.c.bf16 %v279_v42, %v278_v41  ;;  %v835_v46 = vpack.c.bf16 %v281_v45, %v280_v44  ;;  %v482_v47 = vld [vmem:[%s1225_s5] sm:$0xff]  ;;  %v483_v49 = vld [vmem:[%s1225_s5 + $0x8] sm:$0xff]  ;;  %v484_v50 = vld [vmem:[%s1225_s5 + $0x10] sm:$0xff] }
  0x16   :  { %726 = vmatmul.mubr.msk.f32.gmra.mrb[4].mxu0 %vm56_vm0, %v34_v23  ;;  %842 = vmatprep.subr.bf16.mxu1 %v819_v25  ;;  %v485_v51 = vld [vmem:[%s1225_s5 + $0x18] sm:$0xff]  ;;  %v486_v52 = vld [vmem:[%s1225_s5 + $0x20] sm:$0xff]  ;;  %v487_v38 = vld [vmem:[%s1225_s5 + $0x28] sm:$0xff] }
  0x17   :  { %728 = vmatprep.mubr.msk.f32.mxu0 %vm56_vm0, %v35_v24  ;;  %818 = vmatpush3.bf16.msra.mxu0 %v815_v20  ;;  %v1135_v53 = vld [vmem:[%s1222_s2] ss:$0 sm:$0xff]  ;;  %v488_v39 = vld [vmem:[%s1225_s5 + $0x30] sm:$0xff]  ;;  %v491_v42 = vld [vmem:[%s1225_s5 + $0x48] sm:$0xff] }
  0x18   :  { %820 = vmatprep.subr.bf16.mxu0 %v819_v25  ;;  %500 = vperm.xlu1 %857, %v482_v47   ;;  %v490_v41 = vld [vmem:[%s1225_s5 + $0x40] sm:$0xff]  ;;  %v493_v44 = vld [vmem:[%s1225_s5 + $0x58] sm:$0xff]  ;;  %v496_v47 = vld [vmem:[%s1225_s5 + $0x70] sm:$0xff] }
  0x19   :  { %850 = vmatpush3.bf16.msra.mxu1 %v819_v25  ;;  %v494_v45 = vld [vmem:[%s1225_s5 + $0x60] sm:$0xff] }
  0x1a   :  { %729 = vmatmul.mubr.msk.f32.gmra.mrb[6].mxu0 %vm56_vm0, %v36_v28  ;;  %843 = vmatprep.subr.bf16.mxu1 %v823_v30 }
  0x1b   :  { %731 = vmatprep.mubr.msk.f32.mxu0 %vm56_vm0, %v37_v29  ;;  %822 = vmatpush3.bf16.msra.mxu0 %v819_v25 }
  0x1c   :  { %824 = vmatprep.subr.bf16.mxu0 %v823_v30  ;;  %505 = vperm.xlu1 %857, %v483_v49   ;;  %v497_v49 = vld [vmem:[%s1225_s5 + $0x78] sm:$0xff] }
  0x1d   :  { %851 = vmatpush3.bf16.msra.mxu1 %v823_v30 }
  0x1e   :  { %732 = vmatmul.mubr.msk.f32.gmra.mrb[8].mxu0 %vm56_vm0, %v38_v31  ;;  %844 = vmatprep.subr.bf16.mxu1 %v827_v40 }
  0x1f   :  { %734 = vmatprep.mubr.msk.f32.mxu0 %vm56_vm0, %v39_v32  ;;  %826 = vmatpush3.bf16.msra.mxu0 %v823_v30 }
  0x20   :  { %828 = vmatprep.subr.bf16.mxu0 %v827_v40  ;;  %510 = vperm.xlu1 %857, %v484_v50   ;;  %v1189_v50 = vld [vmem:[%s1224_s4] ss:$0 sm:$0xff]  ;;  %s948_s4 = smov [#allocation3]  }
  0x21   :  { %852 = vmatpush3.bf16.msra.mxu1 %v827_v40 }
  0x22   :  { %735 = vmatmul.mubr.msk.f32.gmra.mrb[10].mxu0 %vm56_vm0, %v40_v33  ;;  %845 = vmatprep.subr.bf16.mxu1 %v831_v43 }
  0x23   :  { %737 = vmatprep.mubr.msk.f32.mxu0 %vm56_vm0, %v41_v34  ;;  %830 = vmatpush3.bf16.msra.mxu0 %v827_v40  ;;  %v489_v40 = vld [vmem:[%s1225_s5 + $0x38] sm:$0xff] }
  0x24   :  { %832 = vmatprep.subr.bf16.mxu0 %v831_v43  ;;  %515 = vperm.xlu1 %857, %v485_v51  }
  0x25   :  { %853 = vmatpush3.bf16.msra.mxu1 %v831_v43 }
  0x26   :  { %738 = vmatmul.mubr.msk.f32.gmra.mrb[12].mxu0 %vm56_vm0, %v42_v35  ;;  %846 = vmatprep.subr.bf16.mxu1 %v835_v46 }
  0x27   :  { %740 = vmatprep.mubr.msk.f32.mxu0 %vm56_vm0, %v43_v36  ;;  %834 = vmatpush3.bf16.msra.mxu0 %v831_v43  ;;  %v492_v43 = vld [vmem:[%s1225_s5 + $0x50] sm:$0xff] }
  0x28   :  { %836 = vmatprep.subr.bf16.mxu0 %v835_v46  ;;  %520 = vperm.xlu1 %857, %v486_v52  }
  0x29   :  { %854 = vmatpush3.bf16.msra.mxu1 %v835_v46 }
  0x2a   :  { %741 = vmatmul.mubr.msk.f32.gmra.mrb[14].mxu0 %vm56_vm0, %v44_v37 }
  0x2b   :  { %838 = vmatpush3.bf16.msra.mxu0 %v835_v46  ;;  %v495_v46 = vld [vmem:[%s1225_s5 + $0x68] sm:$0xff]  ;;  %s633_s5 = sshll.u32 %s948_s4, 4  ;;  %s634_s5 = int_to_ptr.vmem [resolvable:$true] %s633_s5 }
  0x2c   :  { %525 = vperm.xlu1 %857, %v487_v38   ;;  %s923_s29 = scalar_lea.vmem %s634_s5, 16  ;;  %s927_s30 = scalar_lea.vmem %s634_s5, 32 }
  0x2d   :  { %p924_p0 = scmp.ne.s32.totalorder %s634_s5, %s923_s29  ;;  %p928_p1 = scmp.lt.s32.totalorder %s634_s5, %s634_s5 }
  0x2e   :  { %p929_p2 = scmp.lt.s32.totalorder %s927_s30, %s923_s29 }
  0x30   :  { %530 = vperm.xlu1 %857, %v488_v39   ;;  %p930_p3 = por %p929_p2, %p928_p1 }
  0x32   :  { %p931_p4 = pnand %p930_p3, %p924_p0 }
  0x34   :  { %535 = vperm.xlu1 %857, %v489_v40  }
  0x38   :  { %540 = vperm.xlu1 %857, %v490_v41  }
  0x3c   :  { %545 = vperm.xlu1 %857, %v491_v42  }
  0x40   :  { %550 = vperm.xlu1 %857, %v492_v43  }
  0x44   :  { %555 = vperm.xlu1 %857, %v493_v44  }
  0x48   :  { %560 = vperm.xlu1 %857, %v494_v45  }
  0x4c   :  { %565 = vperm.xlu1 %857, %v495_v46  }
  0x50   :  { %570 = vperm.xlu1 %857, %v496_v47  }
  0x54   :  { %575 = vperm.xlu1 %857, %v497_v49  }
  0xe1   :  { %v721_v54 = vpop.f32.mrb[0].mxu0 }
  0xe2   :  { %v177_v55 = vadd.f32 %v721_v54, %v1135_v53  ;;  %v171_v56 = vpop.f32.mrb[1].mxu0 }
  0xe3   :  { %v172_v57 = vadd.f32 %v1135_v53, %v171_v56 }
  0xe5   :  { %859 = vtanh.f32 %v172_v57  ;;  %v724_v58 = vpop.f32.mrb[2].mxu0 }
  0xe6   :  { %861 = vtanh.f32 %v177_v55  ;;  %v187_v59 = vadd.f32 %v724_v58, %v1135_v53  ;;  %v181_v60 = vpop.f32.mrb[3].mxu0 }
  0xe7   :  { %v182_v61 = vadd.f32 %v1135_v53, %v181_v60 }
  0xe8   :  { %863 = vtanh.f32 %v187_v59 }
  0xe9   :  { %865 = vtanh.f32 %v182_v61  ;;  %v727_v62 = vpop.f32.mrb[4].mxu0 }
  0xea   :  { %v197_v63 = vadd.f32 %v727_v62, %v1135_v53  ;;  %v191_v0 = vpop.f32.mrb[5].mxu0 }
  0xeb   :  { %v192_v1 = vadd.f32 %v1135_v53, %v191_v0 }
  0xec   :  { %867 = vtanh.f32 %v197_v63 }
  0xed   :  { %869 = vtanh.f32 %v192_v1  ;;  %v730_v2 = vpop.f32.mrb[6].mxu0 }
  0xee   :  { %v207_v3 = vadd.f32 %v730_v2, %v1135_v53  ;;  %v201_v4 = vpop.f32.mrb[7].mxu0 }
  0xef   :  { %v860_v5 = vpop.eup %859  ;;  %v202_v6 = vadd.f32 %v1135_v53, %v201_v4 }
  0xf0   :  { %v862_v7 = vpop.eup %861  ;;  %775 = vmatprep.mubr.f32.mxu0 %v860_v5  ;;  %871 = vtanh.f32 %v207_v3 }
  0xf1   :  { %776 = vmatmul.mubr.f32.vlgmr.msra.gmra.mrb[16].mxu0 %v862_v7  ;;  %873 = vtanh.f32 %v202_v6  ;;  %v733_v8 = vpop.f32.mrb[8].mxu0 }
  0xf2   :  { %v864_v9 = vpop.eup %863  ;;  %v217_v10 = vadd.f32 %v733_v8, %v1135_v53  ;;  %v211_v11 = vpop.f32.mrb[9].mxu0 }
  0xf3   :  { %v866_v12 = vpop.eup %865  ;;  %v212_v13 = vadd.f32 %v1135_v53, %v211_v11 }
  0xf4   :  { %778 = vmatprep.mubr.f32.mxu0 %v866_v12  ;;  %875 = vtanh.f32 %v217_v10 }
  0xf5   :  { %779 = vmatmul.mubr.f32.gmra.mrb[18].mxu0 %v864_v9  ;;  %877 = vtanh.f32 %v212_v13  ;;  %v736_v14 = vpop.f32.mrb[10].mxu0 }
  0xf6   :  { %v868_v15 = vpop.eup %867  ;;  %v227_v16 = vadd.f32 %v736_v14, %v1135_v53  ;;  %v221_v17 = vpop.f32.mrb[11].mxu0 }
  0xf7   :  { %v870_v18 = vpop.eup %869  ;;  %v222_v19 = vadd.f32 %v1135_v53, %v221_v17 }
  0xf8   :  { %781 = vmatprep.mubr.f32.mxu0 %v870_v18  ;;  %879 = vtanh.f32 %v227_v16 }
  0xf9   :  { %782 = vmatmul.mubr.f32.gmra.mrb[20].mxu0 %v868_v15  ;;  %881 = vtanh.f32 %v222_v19  ;;  %v739_v20 = vpop.f32.mrb[12].mxu0 }
  0xfa   :  { %v872_v21 = vpop.eup %871  ;;  %v237_v22 = vadd.f32 %v739_v20, %v1135_v53  ;;  %v231_v23 = vpop.f32.mrb[13].mxu0 }
  0xfb   :  { %v874_v24 = vpop.eup %873  ;;  %v232_v25 = vadd.f32 %v1135_v53, %v231_v23 }
  0xfc   :  { %784 = vmatprep.mubr.f32.mxu1 %v874_v24  ;;  %883 = vtanh.f32 %v237_v22 }
  0xfd   :  { %785 = vmatmul.mubr.f32.vlgmr.msra.gmra.mrb[0].mxu1 %v872_v21  ;;  %885 = vtanh.f32 %v232_v25  ;;  %v742_v26 = vpop.f32.mrb[14].mxu0 }
  0xfe   :  { %v876_v27 = vpop.eup %875  ;;  %v247_v28 = vadd.f32 %v742_v26, %v1135_v53  ;;  %v241_v29 = vpop.f32.mrb[15].mxu0 }
  0xff   :  { %v878_v30 = vpop.eup %877  ;;  %v242_v31 = vadd.f32 %v1135_v53, %v241_v29 }
 0x100   :  { %787 = vmatprep.mubr.f32.mxu1 %v878_v30  ;;  %887 = vtanh.f32 %v247_v28 }
 0x101   :  { %788 = vmatmul.mubr.f32.gmra.mrb[2].mxu1 %v876_v27  ;;  %889 = vtanh.f32 %v242_v31 }
 0x102   :  { %v880_v32 = vpop.eup %879 }
 0x103   :  { %v882_v33 = vpop.eup %881 }
 0x104   :  { %790 = vmatprep.mubr.f32.mxu1 %v882_v33 }
 0x105   :  { %791 = vmatmul.mubr.f32.gmra.mrb[4].mxu1 %v880_v32 }
 0x106   :  { %v884_v34 = vpop.eup %883 }
 0x107   :  { %v886_v35 = vpop.eup %885 }
 0x108   :  { %793 = vmatprep.mubr.f32.mxu1 %v886_v35  ;;  %v615_v35 = vld [vmem:[#allocation2] sm:$0x1] }
 0x109   :  { %794 = vmatmul.mubr.f32.gmra.mrb[6].mxu1 %v884_v34 }
 0x10a   :  { %v888_v36 = vpop.eup %887 }
 0x10b   :  { %v890_v37 = vpop.eup %889 }
 0x10c   :  { %796 = vmatprep.mubr.f32.mxu1 %v890_v37 }
 0x10d   :  { %797 = vmatmul.mubr.f32.gmra.mrb[8].mxu1 %v888_v36  ;;  %v501_v36 = vpop.permute.xlu1 %500 }
 0x111   :  { %v506_v37 = vpop.permute.xlu1 %505 }
 0x115   :  { %v511_v38 = vpop.permute.xlu1 %510 }
 0x119   :  { %v516_v40 = vpop.permute.xlu1 %515 }
 0x11d   :  { %v521_v42 = vpop.permute.xlu1 %520 }
 0x121   :  { %v526_v45 = vpop.permute.xlu1 %525 }
 0x125   :  { %v531_v47 = vpop.permute.xlu1 %530 }
 0x1c4   :  { %v777_v51 = vpop.f32.mrb[16].mxu0 }
 0x1c5   :  { %v355_v52 = vpop.f32.mrb[17].mxu0  ;;  %v361_v54 = vadd.f32 %v777_v51, %v1189_v50  ;;  %v536_v51 = vpop.permute.xlu1 %535 }
 0x1c6   :  { %v356_v53 = vadd.f32 %v1189_v50, %v355_v52 }
 0x1c8   :  { %891 = vtanh.f32 %v356_v53  ;;  %v780_v55 = vpop.f32.mrb[18].mxu0 }
 0x1c9   :  { %v365_v56 = vpop.f32.mrb[19].mxu0  ;;  %893 = vtanh.f32 %v361_v54  ;;  %v371_v60 = vadd.f32 %v780_v55, %v1189_v50  ;;  %v541_v53 = vpop.permute.xlu1 %540 }
 0x1ca   :  { %v366_v57 = vadd.f32 %v1189_v50, %v365_v56 }
 0x1cc   :  { %v783_v58 = vpop.f32.mrb[20].mxu0  ;;  %895 = vtanh.f32 %v366_v57 }
 0x1cd   :  { %v375_v59 = vpop.f32.mrb[21].mxu0  ;;  %897 = vtanh.f32 %v371_v60  ;;  %v381_v4 = vadd.f32 %v783_v58, %v1189_v50  ;;  %v546_v57 = vpop.permute.xlu1 %545 }
 0x1ce   :  { %v376_v0 = vadd.f32 %v1189_v50, %v375_v59 }
 0x1d0   :  { %v786_v61 = vpop.f32.mrb[0].mxu1  ;;  %899 = vtanh.f32 %v376_v0 }
 0x1d1   :  { %v385_v62 = vpop.f32.mrb[1].mxu1  ;;  %901 = vtanh.f32 %v381_v4  ;;  %v391_v12 = vadd.f32 %v786_v61, %v1189_v50 }
 0x1d2   :  { %v892_v63 = vpop.eup %891  ;;  %v386_v8 = vadd.f32 %v1189_v50, %v385_v62 }
 0x1d3   :  { %450 = vxpose.xlu0.b32.start [1/16] %v892_v63, 128  ;;  %v894_v3 = vpop.eup %893  ;;  %v551_v63 = vpop.permute.xlu1 %550 }
 0x1d4   :  { %v789_v1 = vpop.f32.mrb[2].mxu1  ;;  %903 = vtanh.f32 %v386_v8 }
 0x1d5   :  { %v395_v2 = vpop.f32.mrb[3].mxu1  ;;  %905 = vtanh.f32 %v391_v12  ;;  %v401_v18 = vadd.f32 %v789_v1, %v1189_v50 }
 0x1d6   :  { %v896_v7 = vpop.eup %895  ;;  %v396_v16 = vadd.f32 %v1189_v50, %v395_v2 }
 0x1d7   :  { %451 = vxpose.xlu0.b32.cont [2/16] %v894_v3, 128  ;;  %v898_v11 = vpop.eup %897  ;;  %v556_v3 = vpop.permute.xlu1 %555 }
 0x1d8   :  { %v792_v5 = vpop.f32.mrb[4].mxu1  ;;  %907 = vtanh.f32 %v396_v16 }
 0x1d9   :  { %v405_v6 = vpop.f32.mrb[5].mxu1  ;;  %909 = vtanh.f32 %v401_v18  ;;  %v411_v22 = vadd.f32 %v792_v5, %v1189_v50 }
 0x1da   :  { %v900_v15 = vpop.eup %899  ;;  %v406_v20 = vadd.f32 %v1189_v50, %v405_v6 }
 0x1db   :  { %452 = vxpose.xlu0.b32.cont [3/16] %v896_v7, 128  ;;  %v902_v17 = vpop.eup %901 }
 0x1dc   :  { %v795_v9 = vpop.f32.mrb[6].mxu1  ;;  %911 = vtanh.f32 %v406_v20 }
 0x1dd   :  { %v415_v10 = vpop.f32.mrb[7].mxu1  ;;  %913 = vtanh.f32 %v411_v22  ;;  %v421_v26 = vadd.f32 %v795_v9, %v1189_v50  ;;  %v561_v9 = vpop.permute.xlu1 %560 }
 0x1de   :  { %v904_v19 = vpop.eup %903  ;;  %v416_v24 = vadd.f32 %v1189_v50, %v415_v10 }
 0x1df   :  { %453 = vxpose.xlu0.b32.cont [4/16] %v898_v11, 128  ;;  %v906_v21 = vpop.eup %905 }
 0x1e0   :  { %v798_v13 = vpop.f32.mrb[8].mxu1  ;;  %915 = vtanh.f32 %v416_v24 }
 0x1e1   :  { %v425_v14 = vpop.f32.mrb[9].mxu1  ;;  %917 = vtanh.f32 %v421_v26  ;;  %v431_v30 = vadd.f32 %v798_v13, %v1189_v50 }
 0x1e2   :  { %v908_v23 = vpop.eup %907  ;;  %v426_v28 = vadd.f32 %v1189_v50, %v425_v14  ;;  %v566_v14 = vpop.permute.xlu1 %565 }
 0x1e3   :  { %454 = vxpose.xlu0.b32.cont [5/16] %v900_v15, 128  ;;  %v910_v25 = vpop.eup %909 }
 0x1e4   :  { %919 = vtanh.f32 %v426_v28 }
 0x1e5   :  { %921 = vtanh.f32 %v431_v30 }
 0x1e6   :  { %v912_v27 = vpop.eup %911  ;;  %v571_v22 = vpop.permute.xlu1 %570 }
 0x1e7   :  { %455 = vxpose.xlu0.b32.cont [6/16] %v902_v17, 128  ;;  %v914_v29 = vpop.eup %913 }
 0x1ea   :  { %v916_v31 = vpop.eup %915  ;;  %v576_v30 = vpop.permute.xlu1 %575 }
 0x1eb   :  { %456 = vxpose.xlu0.b32.cont [7/16] %v904_v19, 128  ;;  %v918_v32 = vpop.eup %917 }
 0x1ee   :  { %v920_v33 = vpop.eup %919 }
 0x1ef   :  { %457 = vxpose.xlu0.b32.cont [8/16] %v906_v21, 128  ;;  %v922_v34 = vpop.eup %921 }
 0x1f3   :  { %458 = vxpose.xlu0.b32.cont [9/16] %v908_v23, 128 }
 0x1f7   :  { %459 = vxpose.xlu0.b32.cont [10/16] %v910_v25, 128 }
 0x1fb   :  { %460 = vxpose.xlu0.b32.cont [11/16] %v912_v27, 128 }
 0x1ff   :  { %461 = vxpose.xlu0.b32.cont [12/16] %v914_v29, 128 }
 0x203   :  { %462 = vxpose.xlu0.b32.cont [13/16] %v916_v31, 128 }
 0x207   :  { %463 = vxpose.xlu0.b32.cont [14/16] %v918_v32, 128 }
 0x20b   :  { %464 = vxpose.xlu0.b32.cont [15/16] %v920_v33, 128 }
 0x20f   :  { %465 = vxpose.xlu0.b32.end [16/16] %v922_v34, 128 }
 0x238   :  { %858 = vset.pattern.permute.xlu0 %v947_v48 }
 0x239   :  { %618 = vperm.xlu0 %858, %v615_v35  }
 0x253   :  { %v466_v39 = vpop.trf.xlu0 }
 0x254   :  { %v578_v48 = vmul.f32 %v501_v36, %v466_v39 }
 0x257   :  { %v467_v41 = vpop.trf.xlu0 }
 0x258   :  { %v579_v55 = vmul.f32 %v506_v37, %v467_v41 }
 0x25a   :  { %v594_v58 = vadd.f32 %v579_v55, %v578_v48 }
 0x25b   :  { %v468_v43 = vpop.trf.xlu0 }
 0x25c   :  { %v580_v59 = vmul.f32 %v511_v38, %v468_v43  ;;  %v621_v38 = vlaneseq }
 0x25e   :  { %v595_v61 = vadd.f32 %v594_v58, %v580_v59  ;;  %v622_v39 = vshrl.u32 %v621_v38, 7 }
 0x25f   :  { %v469_v44 = vpop.trf.xlu0 }
 0x260   :  { %v581_v62 = vmul.f32 %v516_v40, %v469_v44  ;;  %v623_v41 = vsub.s32 0, %v622_v39 }
 0x262   :  { %v596_v0 = vadd.f32 %v595_v61, %v581_v62 }
 0x263   :  { %v470_v46 = vpop.trf.xlu0 }
 0x264   :  { %v582_v1 = vmul.f32 %v521_v42, %v470_v46 }
 0x266   :  { %v597_v4 = vadd.f32 %v596_v0, %v582_v1 }
 0x267   :  { %v471_v49 = vpop.trf.xlu0 }
 0x268   :  { %v583_v5 = vmul.f32 %v526_v45, %v471_v49 }
 0x26a   :  { %v598_v7 = vadd.f32 %v597_v4, %v583_v5 }
 0x26b   :  { %v472_v50 = vpop.trf.xlu0 }
 0x26c   :  { %v584_v8 = vmul.f32 %v531_v47, %v472_v50 }
 0x26e   :  { %v599_v10 = vadd.f32 %v598_v7, %v584_v8 }
 0x26f   :  { %v473_v52 = vpop.trf.xlu0 }
 0x270   :  { %v585_v11 = vmul.f32 %v536_v51, %v473_v52 }
 0x272   :  { %v600_v15 = vadd.f32 %v599_v10, %v585_v11 }
 0x273   :  { %v474_v54 = vpop.trf.xlu0 }
 0x274   :  { %v586_v13 = vmul.f32 %v541_v53, %v474_v54 }
 0x276   :  { %v601_v17 = vadd.f32 %v600_v15, %v586_v13 }
 0x277   :  { %v475_v56 = vpop.trf.xlu0 }
 0x278   :  { %v587_v16 = vmul.f32 %v546_v57, %v475_v56 }
 0x27a   :  { %v602_v20 = vadd.f32 %v601_v17, %v587_v16 }
 0x27b   :  { %v476_v60 = vpop.trf.xlu0 }
 0x27c   :  { %v588_v18 = vmul.f32 %v551_v63, %v476_v60 }
 0x27e   :  { %v603_v23 = vadd.f32 %v602_v20, %v588_v18 }
 0x27f   :  { %v477_v2 = vpop.trf.xlu0 }
 0x280   :  { %v589_v21 = vmul.f32 %v556_v3, %v477_v2 }
 0x282   :  { %v604_v25 = vadd.f32 %v603_v23, %v589_v21 }
 0x283   :  { %v478_v6 = vpop.trf.xlu0 }
 0x284   :  { %v590_v24 = vmul.f32 %v561_v9, %v478_v6 }
 0x286   :  { %v605_v28 = vadd.f32 %v604_v25, %v590_v24 }
 0x287   :  { %v479_v12 = vpop.trf.xlu0 }
 0x288   :  { %v591_v26 = vmul.f32 %v566_v14, %v479_v12 }
 0x28a   :  { %v606_v31 = vadd.f32 %v605_v28, %v591_v26 }
 0x28b   :  { %v480_v19 = vpop.trf.xlu0 }
 0x28c   :  { %v592_v29 = vmul.f32 %v571_v22, %v480_v19 }
 0x28e   :  { %v607_v33 = vadd.f32 %v606_v31, %v592_v29 }
 0x28f   :  { %v481_v27 = vpop.trf.xlu0 }
 0x290   :  { %v593_v32 = vmul.f32 %v576_v30, %v481_v27 }
 0x292   :  { %v608_v34 = vadd.f32 %v607_v33, %v593_v32 }
 0x294   :  { %v609_v35 = vrot.slane %v608_v34, 4 }
 0x296   :  { %v610_v36 = vadd.f32 %v609_v35, %v608_v34 }
 0x298   :  { %v611_v37 = vrot.slane %v610_v36, 2 }
 0x29a   :  { %v612_v40 = vadd.f32 %v611_v37, %v610_v36 }
 0x29c   :  { %v613_v42 = vrot.slane %v612_v40, 1 }
 0x29e   :  { %v614_v45 = vadd.f32 %v613_v42, %v612_v40 }
 0x2b8   :  { %v619_v43 = vpop.permute.xlu0 %618 }
 0x2b9   :  { %v624_v44 = vrot.slane %v619_v43, %v623_v41 }
 0x2bb   :  { %v625_v46 = vadd.f32 %v624_v44, %v614_v45 }
 0x2bd   :  { %626 = vst [vmem:[#allocation3] sm:$0x1] %v625_v46 }
 0x2be   :  { %934 = shalt.err (!%p931_p4)
}
 0x2bf   :  { %s935_s2 = scalar_lea.hbm %s1227_s7, 16 }
 0x2c0   :  { %p936_p5 = scmp.ne.s32.totalorder %s1227_s7, %s935_s2  ;;  %p939_p6 = scmp.lt.u32.totalorder %s935_s2, %s1227_s7 }
 0x2c2   :  { %p941_p7 = pnand %p939_p6, %p936_p5 }
 0x2c4   :  { %944 = shalt.err (!%p941_p7)
}
 0x2c5   :  { %636 = dma.vmem_to_hbm [thread:$0]  %s634_s5, 16, %s1227_s7, [#allocation4]  }
 0x2c6   :  { %945 = dma.done.wait [#allocation4], 16  }
 0x2c7   :  { %946 = vsyncadd [#allocation4], 4294967280 }
 0x2c8   :  { %640 = vsyncpa [#allocation4], 1 }

</bundles_post_ra>
